<compile_context>
chip_gen: v7x
topology: tpu7x:2x2x1
jax: 0.10.0
libtpu: 0.0.40
codegen_flags: <defaults>
</compile_context>

<pallas_src>
import jax
import jax.numpy as jnp
from jax.experimental import pallas as pl
from jax.experimental.pallas import tpu as pltpu


def _round_up(x, m):
    return ((x + m - 1) // m) * m


def _vmem_limit_bytes():
    # Generation-aware scoped VMEM: ~48 MiB on v7x (64 MiB physical),
    # ~96 MiB on v5e/v6e (128 MiB physical). Conservative fallback if the
    # query is unavailable.
    try:
        cap = int(pltpu.get_tpu_info().vmem_capacity_bytes)
    except Exception:
        cap = 64 * 1024 * 1024
    return int(min(cap * 3 // 4, 100 * 1024 * 1024))


# --------------------------------------------------------------------------
# Kernel 1: encoder.  K-split of X/W1 over the item axis, f32 accumulator.
# Produces g = tanh(tanh(tanh(X@W1+b1)@W2+b2)@W3+b3)  (decoder pre-W4 act).
# --------------------------------------------------------------------------
def encoder_kernel(x_ref, w1_ref, b1_ref, w2_ref, b2_ref, w3_ref, b3_ref,
                   g_ref, acc_ref):
    k = pl.program_id(1)

    @pl.when(k == 0)
    def _():
        acc_ref[...] = jnp.zeros_like(acc_ref)

    # bf16 x bf16 -> f32 accumulation on the MXU.
    acc_ref[...] += jnp.dot(x_ref[...], w1_ref[...],
                            preferred_element_type=jnp.float32)

    @pl.when(k == pl.num_programs(1) - 1)
    def _():
        h1 = jnp.tanh(acc_ref[...] + b1_ref[...])                      # (bt, Hp)
        h2 = jnp.tanh(jnp.dot(h1.astype(jnp.bfloat16), w2_ref[...],
                              preferred_element_type=jnp.float32) + b2_ref[...])
        g = jnp.tanh(jnp.dot(h2.astype(jnp.bfloat16), w3_ref[...],
                             preferred_element_type=jnp.float32) + b3_ref[...])
        g_ref[...] = g.astype(g_ref.dtype)


# --------------------------------------------------------------------------
# Kernel 2: fused decoder + log_softmax.
#   phase 0 (p=0): online log-sum-exp across the M tiles (no logits to HBM)
#   phase 1 (p=1): recompute logits tile, write logits - lse directly.
# --------------------------------------------------------------------------
def decoder_kernel(g_ref, w4_ref, b4_ref, out_ref, m_ref, l_ref, lse_ref):
    p = pl.program_id(1)
    j = pl.program_id(2)
    nj = pl.num_programs(2)

    @pl.when(jnp.logical_and(p == 0, j == 0))
    def _():
        m_ref[...] = jnp.full_like(m_ref, -jnp.inf)
        l_ref[...] = jnp.zeros_like(l_ref)

    logits = jnp.dot(g_ref[...], w4_ref[...],
                     preferred_element_type=jnp.float32) + b4_ref[...]

    @pl.when(p == 0)
    def _():
        m_prev = m_ref[...]
        m_new = jnp.maximum(m_prev, jnp.max(logits, axis=1, keepdims=True))
        l_ref[...] = (l_ref[...] * jnp.exp(m_prev - m_new)
                      + jnp.sum(jnp.exp(logits - m_new), axis=1, keepdims=True))
        m_ref[...] = m_new

    @pl.when(jnp.logical_and(p == 0, j == nj - 1))
    def _():
        lse_ref[...] = m_ref[...] + jnp.log(l_ref[...])

    @pl.when(p == 1)
    def _():
        out_ref[...] = logits - lse_ref[...]


# --------------------------------------------------------------------------
# Param preparation (hoisted out of the per-step forward).
# --------------------------------------------------------------------------
def prepare_params(params, M, *, m_tile=2048):
    """Pad / cast MultiDAE weights once. Returns dict of padded arrays + dims."""
    w1, b1, w2, b2, w3, b3, w4, b4 = params
    H = w1.shape[1]
    D = w2.shape[1]
    Hp = _round_up(H, 128)
    Dp = _round_up(D, 128)
    mt = _round_up(max(128, min(m_tile, _round_up(M, 128))), 128)
    Mp = _round_up(M, mt)

    def pad2(a, rows, cols, fill=0.0):
        return jnp.pad(a, ((0, rows - a.shape[0]), (0, cols - a.shape[1])),
                       constant_values=fill)

    return dict(
        w1=pad2(w1, Mp, Hp).astype(jnp.bfloat16),
        b1=pad2(b1, 1, Hp).astype(jnp.float32),
        w2=pad2(w2, Hp, Dp).astype(jnp.bfloat16),
        b2=pad2(b2, 1, Dp).astype(jnp.float32),
        w3=pad2(w3, Dp, Hp).astype(jnp.bfloat16),
        b3=pad2(b3, 1, Hp).astype(jnp.float32),
        w4=pad2(w4, Hp, Mp).astype(jnp.bfloat16),
        # Padded logit columns must vanish from the log-sum-exp.
        b4=pad2(b4, 1, Mp, fill=-1e30).astype(jnp.float32),
        M=M, Mp=Mp, Hp=Hp, Dp=Dp, mt=mt,
    )


# --------------------------------------------------------------------------
# Wrapper
# --------------------------------------------------------------------------
def multidae_forward(X, prepared, *, b_tile=256):
    """MultiDAE forward (inference). Returns (log_softmax_logits, None x5)."""
    B, M = X.shape
    assert M == prepared["M"], "prepare_params was built for a different M"
    Mp, Hp, Dp, mt = prepared["Mp"], prepared["Hp"], prepared["Dp"], prepared["mt"]

    # Batch tiling: prefer >=2 batch tiles (v7x megacore) when batch allows.
    if B >= 2 * b_tile:
        bt = b_tile
    elif B >= 16:
        bt = _round_up((B + 1) // 2, 8)
    else:
        bt = _round_up(max(B, 1), 8)
    Bp = _round_up(B, bt)
    nb = Bp // bt
    nm = Mp // mt

    xb = X.astype(jnp.bfloat16)
    if (Bp, Mp) != (B, M):
        xb = jnp.pad(xb, ((0, Bp - B), (0, Mp - M)))

    vmem_limit = _vmem_limit_bytes()

    # ---------------- encoder ----------------
    g = pl.pallas_call(
        encoder_kernel,
        out_shape=jax.ShapeDtypeStruct((Bp, Hp), jnp.bfloat16),
        grid=(nb, nm),
        in_specs=[
            pl.BlockSpec((bt, mt), lambda i, k: (i, k)),   # X   (K-split)
            pl.BlockSpec((mt, Hp), lambda i, k: (k, 0)),   # W1  (K-split)
            pl.BlockSpec((1, Hp), lambda i, k: (0, 0)),    # b1
            pl.BlockSpec((Hp, Dp), lambda i, k: (0, 0)),   # W2  (resident)
            pl.BlockSpec((1, Dp), lambda i, k: (0, 0)),    # b2
            pl.BlockSpec((Dp, Hp), lambda i, k: (0, 0)),   # W3  (resident)
            pl.BlockSpec((1, Hp), lambda i, k: (0, 0)),    # b3
        ],
        out_specs=pl.BlockSpec((bt, Hp), lambda i, k: (i, 0)),
        scratch_shapes=[pltpu.VMEM((bt, Hp), jnp.float32)],
        compiler_params=pltpu.CompilerParams(
            dimension_semantics=("parallel", "arbitrary"),
            vmem_limit_bytes=vmem_limit),
        cost_estimate=pl.CostEstimate(
            flops=2 * Bp * (Mp * Hp + Hp * Dp + Dp * Hp),
            transcendentals=Bp * (2 * Hp + Dp),
            bytes_accessed=(Bp * Mp * 2                       # X
                            + nb * Mp * Hp * 2                # W1 per batch tile
                            + nb * (Hp * Dp + Dp * Hp) * 2    # W2/W3 per batch tile
                            + Bp * Hp * 2)),                  # g out
    )(xb, prepared["w1"], prepared["b1"], prepared["w2"], prepared["b2"],
      prepared["w3"], prepared["b3"])

    # ---------------- fused decoder + log_softmax ----------------
    out_p = pl.pallas_call(
        decoder_kernel,
        out_shape=jax.ShapeDtypeStruct((Bp, Mp), jnp.float32),
        grid=(nb, 2, nm),
        in_specs=[
            pl.BlockSpec((bt, Hp), lambda i, p, j: (i, 0)),   # g   (resident / batch tile)
            pl.BlockSpec((Hp, mt), lambda i, p, j: (0, j)),   # W4  (N-split, 2 sweeps)
            pl.BlockSpec((1, mt), lambda i, p, j: (0, j)),    # b4
        ],
        # Phase 0 parks on block (i, 0); phase 1 writes block (i, j).
        out_specs=pl.BlockSpec((bt, mt), lambda i, p, j: (i, p * j)),
        scratch_shapes=[pltpu.VMEM((bt, 1), jnp.float32),     # running max
                        pltpu.VMEM((bt, 1), jnp.float32),     # running sum-exp
                        pltpu.VMEM((bt, 1), jnp.float32)],    # lse
        compiler_params=pltpu.CompilerParams(
            dimension_semantics=("parallel", "arbitrary", "arbitrary"),
            vmem_limit_bytes=vmem_limit),
        cost_estimate=pl.CostEstimate(
            flops=2 * 2 * Bp * Hp * Mp,
            transcendentals=Bp * Mp + Bp,
            bytes_accessed=(Bp * Hp * 2                       # g
                            + 2 * nb * Hp * Mp * 2            # W4, 2 sweeps / batch tile
                            + 2 * nb * Mp * 4                 # b4
                            + Bp * Mp * 4)),                  # out (single f32 pass)
    )(g, prepared["w4"], prepared["b4"])

    out = out_p if (Bp, Mp) == (B, M) else out_p[:B, :M]
    # Matches nn.Module.forward: (logits, None, None, None, None, None)
    return (out, None, None, None, None, None)


# --------------------------------------------------------------------------
# Params / reference / loss
# --------------------------------------------------------------------------
def init_params(key, M, D):
    """Deterministic init mirroring the module's layer shapes (stored (in, out))."""
    H = 3 * D
    ks = jax.random.split(key, 8)

    def lin(kw, kb, fan_in, fan_out):
        bound = 1.0 / jnp.sqrt(fan_in)
        w = jax.random.uniform(kw, (fan_in, fan_out), jnp.float32, -bound, bound)
        b = jax.random.uniform(kb, (1, fan_out), jnp.float32, -bound, bound)
        return w, b

    w1, b1 = lin(ks[0], ks[1], M, H)   # encoder Linear(M, H)
    w2, b2 = lin(ks[2], ks[3], H, D)   # encoder Linear(H, D)
    w3, b3 = lin(ks[4], ks[5], D, H)   # decoder Linear(D, H)
    w4, b4 = lin(ks[6], ks[7], H, M)   # decoder Linear(H, M)
    return (w1, b1, w2, b2, w3, b3, w4, b4)


def ref_forward(X, params):
    """Pure-JAX reference with the same bf16-at-MXU-inputs discipline."""
    w1, b1, w2, b2, w3, b3, w4, b4 = params
    bf = jnp.bfloat16
    x = X.astype(bf)
    h1 = jnp.tanh(jnp.dot(x, w1.astype(bf), preferred_element_type=jnp.float32) + b1)
    h2 = jnp.tanh(jnp.dot(h1.astype(bf), w2.astype(bf),
                          preferred_element_type=jnp.float32) + b2)
    g = jnp.tanh(jnp.dot(h2.astype(bf), w3.astype(bf),
                         preferred_element_type=jnp.float32) + b3)
    logits = jnp.dot(g.astype(bf), w4.astype(bf),
                     preferred_element_type=jnp.float32) + b4
    return jax.nn.log_softmax(logits, axis=1)


def recon_loss(inputs, logits):
    # torch.mean(torch.sum(-logits * inputs, dim=1))
    return jnp.mean(jnp.sum(-logits * inputs, axis=1))


if __name__ == "__main__":
    key = jax.random.PRNGKey(0)
    k_x, k_p = jax.random.split(key)

    # Small shapes consistent with the module: M items, D latent, H = 3*D.
    # M=300 is deliberately NOT a multiple of 128 to exercise the padding path,
    # and m_tile=128 gives 3 item tiles (K-split accumulator + online LSE).
    B, M, D = 8, 300, 32
    X = (jax.random.uniform(k_x, (B, M), jnp.float32) > 0.8).astype(jnp.float32)

    params = init_params(k_p, M, D)
    prepared = prepare_params(params, M, m_tile=128)   # padding/casts hoisted out

    logits, *rest = multidae_forward(X, prepared, b_tile=256)
    logits = jax.block_until_ready(logits)

    assert logits.shape == (B, M)

    # sanity: log_softmax rows should sum (in prob space) to ~1
    row_prob_sums = jnp.sum(jnp.exp(logits), axis=1)
    assert bool(jnp.all(jnp.abs(row_prob_sums - 1.0) < 1e-3))

    # cross-check against the pure-JAX reference
    ref = ref_forward(X, params)
    assert bool(jnp.max(jnp.abs(logits - ref)) < 1e-2)

    loss = jax.block_until_ready(recon_loss(X, logits))
    assert bool(jnp.isfinite(loss))

    print("KERNEL_OK")
</pallas_src>

<mosaic_0001>
module attributes {stable_mosaic.version = 11 : i64} {
  func.func @encoder_kernel(%arg0: i32, %arg1: i32, %arg2: memref<8x128xbf16, #tpu.memory_space<vmem>>, %arg3: memref<128x128xbf16, #tpu.memory_space<vmem>>, %arg4: memref<1x128xf32, #tpu.memory_space<vmem>>, %arg5: memref<128x128xbf16, #tpu.memory_space<vmem>>, %arg6: memref<1x128xf32, #tpu.memory_space<vmem>>, %arg7: memref<128x128xbf16, #tpu.memory_space<vmem>>, %arg8: memref<1x128xf32, #tpu.memory_space<vmem>>, %arg9: memref<8x128xbf16, #tpu.memory_space<vmem>>, %arg10: memref<8x128xf32, #tpu.memory_space<vmem>>) attributes {dimension_semantics = [#tpu.dimension_semantics<parallel>, #tpu.dimension_semantics<arbitrary>], iteration_bounds = array<i64: 1, 3>, scalar_prefetch = 0 : i64, scratch_operands = 1 : i64, tpu.core_type = #tpu.core_type<tc>, window_params = [{transform_indices = @transform_0, window_bounds = array<i64: 8, 128>}, {transform_indices = @transform_1, window_bounds = array<i64: 128, 128>}, {pipeline_mode = #tpu.pipeline_mode<synchronous>, transform_indices = @transform_2, window_bounds = array<i64: 1, 128>}, {pipeline_mode = #tpu.pipeline_mode<synchronous>, transform_indices = @transform_3, window_bounds = array<i64: 128, 128>}, {pipeline_mode = #tpu.pipeline_mode<synchronous>, transform_indices = @transform_4, window_bounds = array<i64: 1, 128>}, {pipeline_mode = #tpu.pipeline_mode<synchronous>, transform_indices = @transform_5, window_bounds = array<i64: 128, 128>}, {pipeline_mode = #tpu.pipeline_mode<synchronous>, transform_indices = @transform_6, window_bounds = array<i64: 1, 128>}, {transform_indices = @transform_7, window_bounds = array<i64: 8, 128>}]} {
    %c0_i32 = arith.constant 0 : i32
    %0 = arith.cmpi eq, %arg1, %c0_i32 : i32
    %1 = arith.extui %0 : i1 to i32
    %c0_i32_0 = arith.constant 0 : i32
    %2 = arith.cmpi ne, %1, %c0_i32_0 : i32
    scf.if %2 {
      %cst_9 = arith.constant 0.000000e+00 : f32
      %12 = vector.broadcast %cst_9 : f32 to vector<8x128xf32>
      %c0_10 = arith.constant 0 : index
      %c0_11 = arith.constant 0 : index
      %13 = vector.load %arg10[%c0_10, %c0_11] : memref<8x128xf32, #tpu.memory_space<vmem>>, vector<8x128xf32>
      tpu.vector_store %arg10[%c0_10, %c0_11], %12 {strides = array<i32>} : memref<8x128xf32, #tpu.memory_space<vmem>>, vector<8x128xf32>,
    } else {
    }
    %c0 = arith.constant 0 : index
    %c0_1 = arith.constant 0 : index
    %3 = vector.load %arg10[%c0, %c0_1] : memref<8x128xf32, #tpu.memory_space<vmem>>, vector<8x128xf32>
    %c0_2 = arith.constant 0 : index
    %c0_3 = arith.constant 0 : index
    %4 = vector.load %arg2[%c0_2, %c0_3] : memref<8x128xbf16, #tpu.memory_space<vmem>>, vector<8x128xbf16>
    %c0_4 = arith.constant 0 : index
    %c0_5 = arith.constant 0 : index
    %5 = vector.load %arg3[%c0_4, %c0_5] : memref<128x128xbf16, #tpu.memory_space<vmem>>, vector<128x128xbf16>
    %cst = arith.constant dense<0.000000e+00> : vector<8x128xf32>
    %6 = tpu.matmul %4, %5, %cst {dimension_numbers = #tpu.dot_dimension_numbers<[1], [0], [0], [1], [0, 0, 1, 1], [], []>} : vector<8x128xbf16>, vector<128x128xbf16>, vector<8x128xf32> -> vector<8x128xf32>
    %7 = arith.addf %3, %6 : vector<8x128xf32>
    %c0_6 = arith.constant 0 : index
    %c0_7 = arith.constant 0 : index
    %8 = vector.load %arg10[%c0_6, %c0_7] : memref<8x128xf32, #tpu.memory_space<vmem>>, vector<8x128xf32>
    tpu.vector_store %arg10[%c0_6, %c0_7], %7 {strides = array<i32>} : memref<8x128xf32, #tpu.memory_space<vmem>>, vector<8x128xf32>,
    %c2_i32 = arith.constant 2 : i32
    %9 = arith.cmpi eq, %arg1, %c2_i32 : i32
    %10 = arith.extui %9 : i1 to i32
    %c0_i32_8 = arith.constant 0 : i32
    %11 = arith.cmpi ne, %10, %c0_i32_8 : i32
    scf.if %11 {
      %c0_9 = arith.constant 0 : index
      %c0_10 = arith.constant 0 : index
      %12 = vector.load %arg10[%c0_9, %c0_10] : memref<8x128xf32, #tpu.memory_space<vmem>>, vector<8x128xf32>
      %c0_11 = arith.constant 0 : index
      %c0_12 = arith.constant 0 : index
      %13 = vector.load %arg4[%c0_11, %c0_12] : memref<1x128xf32, #tpu.memory_space<vmem>>, vector<1x128xf32>
      %14 = vector.broadcast %13 : vector<1x128xf32> to vector<8x128xf32>
      %15 = arith.addf %12, %14 : vector<8x128xf32>
      %16 = math.tanh %15 : vector<8x128xf32>
      %17 = arith.truncf %16 : vector<8x128xf32> to vector<8x128xbf16>
      %c0_13 = arith.constant 0 : index
      %c0_14 = arith.constant 0 : index
      %18 = vector.load %arg5[%c0_13, %c0_14] : memref<128x128xbf16, #tpu.memory_space<vmem>>, vector<128x128xbf16>
      %cst_15 = arith.constant dense<0.000000e+00> : vector<8x128xf32>
      %19 = tpu.matmul %17, %18, %cst_15 {dimension_numbers = #tpu.dot_dimension_numbers<[1], [0], [0], [1], [0, 0, 1, 1], [], []>} : vector<8x128xbf16>, vector<128x128xbf16>, vector<8x128xf32> -> vector<8x128xf32>
      %c0_16 = arith.constant 0 : index
      %c0_17 = arith.constant 0 : index
      %20 = vector.load %arg6[%c0_16, %c0_17] : memref<1x128xf32, #tpu.memory_space<vmem>>, vector<1x128xf32>
      %21 = vector.broadcast %20 : vector<1x128xf32> to vector<8x128xf32>
      %22 = arith.addf %19, %21 : vector<8x128xf32>
      %23 = math.tanh %22 : vector<8x128xf32>
      %24 = arith.truncf %23 : vector<8x128xf32> to vector<8x128xbf16>
      %c0_18 = arith.constant 0 : index
      %c0_19 = arith.constant 0 : index
      %25 = vector.load %arg7[%c0_18, %c0_19] : memref<128x128xbf16, #tpu.memory_space<vmem>>, vector<128x128xbf16>
      %cst_20 = arith.constant dense<0.000000e+00> : vector<8x128xf32>
      %26 = tpu.matmul %24, %25, %cst_20 {dimension_numbers = #tpu.dot_dimension_numbers<[1], [0], [0], [1], [0, 0, 1, 1], [], []>} : vector<8x128xbf16>, vector<128x128xbf16>, vector<8x128xf32> -> vector<8x128xf32>
      %c0_21 = arith.constant 0 : index
      %c0_22 = arith.constant 0 : index
      %27 = vector.load %arg8[%c0_21, %c0_22] : memref<1x128xf32, #tpu.memory_space<vmem>>, vector<1x128xf32>
      %28 = vector.broadcast %27 : vector<1x128xf32> to vector<8x128xf32>
      %29 = arith.addf %26, %28 : vector<8x128xf32>
      %30 = math.tanh %29 : vector<8x128xf32>
      %31 = arith.truncf %30 : vector<8x128xf32> to vector<8x128xbf16>
      %c0_23 = arith.constant 0 : index
      %c0_24 = arith.constant 0 : index
      %32 = vector.load %arg9[%c0_23, %c0_24] : memref<8x128xbf16, #tpu.memory_space<vmem>>, vector<8x128xbf16>
      tpu.vector_store %arg9[%c0_23, %c0_24], %31 {strides = array<i32>} : memref<8x128xbf16, #tpu.memory_space<vmem>>, vector<8x128xbf16>,
    } else {
    }
    return
  }
  func.func @transform_0(%arg0: i32, %arg1: i32) -> (i32, i32) {
    %c0_i32 = arith.constant 0 : i32
    return %arg0, %arg1 : i32, i32
  }
  func.func @transform_1(%arg0: i32, %arg1: i32) -> (i32, i32) {
    %c0_i32 = arith.constant 0 : i32
    %c0_i32_0 = arith.constant 0 : i32
    return %arg1, %c0_i32 : i32, i32
  }
  func.func @transform_2(%arg0: i32, %arg1: i32) -> (i32, i32) {
    %c0_i32 = arith.constant 0 : i32
    %c0_i32_0 = arith.constant 0 : i32
    %c0_i32_1 = arith.constant 0 : i32
    return %c0_i32, %c0_i32_0 : i32, i32
  }
  func.func @transform_3(%arg0: i32, %arg1: i32) -> (i32, i32) {
    %c0_i32 = arith.constant 0 : i32
    %c0_i32_0 = arith.constant 0 : i32
    %c0_i32_1 = arith.constant 0 : i32
    return %c0_i32, %c0_i32_0 : i32, i32
  }
  func.func @transform_4(%arg0: i32, %arg1: i32) -> (i32, i32) {
    %c0_i32 = arith.constant 0 : i32
    %c0_i32_0 = arith.constant 0 : i32
    %c0_i32_1 = arith.constant 0 : i32
    return %c0_i32, %c0_i32_0 : i32, i32
  }
  func.func @transform_5(%arg0: i32, %arg1: i32) -> (i32, i32) {
    %c0_i32 = arith.constant 0 : i32
    %c0_i32_0 = arith.constant 0 : i32
    %c0_i32_1 = arith.constant 0 : i32
    return %c0_i32, %c0_i32_0 : i32, i32
  }
  func.func @transform_6(%arg0: i32, %arg1: i32) -> (i32, i32) {
    %c0_i32 = arith.constant 0 : i32
    %c0_i32_0 = arith.constant 0 : i32
    %c0_i32_1 = arith.constant 0 : i32
    return %c0_i32, %c0_i32_0 : i32, i32
  }
  func.func @transform_7(%arg0: i32, %arg1: i32) -> (i32, i32) {
    %c0_i32 = arith.constant 0 : i32
    %c0_i32_0 = arith.constant 0 : i32
    return %arg0, %c0_i32 : i32, i32
  }
}

</mosaic_0001>

<bundles_post_ra>
// kernel: tpu_custom_call.1
= control target key start
LH: loop header
LB: loop body
LE: loop exit
PB: predicated region body
PF: predicated region fallthrough
CT: control target
= control target key end

     0   :  { %s1659_s0 = inlined_call_operand.hbm [shape: bf16[8,384], index: 0, kind: input, shape index: {}]   ;;  %s1660_s1 = inlined_call_operand.hbm [shape: bf16[384,128], index: 1, kind: input, shape index: {}]   ;;  %s1661_s2 = inlined_call_operand.vmem [shape: f32[1,128], index: 2, kind: input, shape index: {}]   ;;  %s1662_s3 = inlined_call_operand.hbm [shape: bf16[128,128], index: 3, kind: input, shape index: {}]   ;;  %s1663_s4 = inlined_call_operand.vmem [shape: f32[1,128], index: 4, kind: input, shape index: {}]   ;;  %s1664_s5 = inlined_call_operand.hbm [shape: bf16[128,128], index: 5, kind: input, shape index: {}]   ;;  %s1665_s6 = inlined_call_operand.vmem [shape: f32[1,128], index: 6, kind: input, shape index: {}]   ;;  %s1666_s7 = inlined_call_operand.hbm [shape: bf16[8,128], index: 7, kind: output, shape index: {}]  }
   0x1   :  { %1672 = sst [smem:[#allocation17_spill]] %s1659_s0 }
   0x2   :  { %1673 = sst [smem:[#allocation18_spill]] %s1662_s3 }
   0x3   :  { %12 = vsyncpa [#allocation4], 0 }
   0x4   :  { %14 = vsyncpa [#allocation4 + $0x1], 0 }
   0x5   :  { %15 = vsyncpa [#allocation7], 0 }
   0x6   :  { %17 = vsyncpa [#allocation7 + $0x1], 0 }
   0x7   :  { %18 = vsyncpa [#allocation10], 0 }
   0x8   :  { %19 = vsyncpa [#allocation5], 0  ;;  %s1366_s24 = smov 0   ;;  %s1368_s25 = smov 0  }
   0x9   :  { %s1370_s26 = smov 0   ;;  %s1372_s27 = smov 0  }
   0xa   :  { %s1374_s28 = smov 0   ;;  %s1376_s29 = smov 0  }
   0xb LB: > { %s1395_s30 = sadd.s32 4294967295, %s1312_s29   ;;  %p59_p0 = scmp.ne.s32.totalorder %s1296_s25, %s1292_s24  ;;  %s1312_s29 = sphi %s1376_s29, %s25_s29   ;;  %s1308_s28 = sphi %s1374_s28, %s1693_s28   ;;  %s1304_s27 = sphi %s1372_s27, %s1692_s27   ;;  %s1300_s26 = sphi %s1370_s26, %s1691_s26   ;;  %s1296_s25 = sphi %s1368_s25, %s1690_s25   ;;  %s1292_s24 = sphi %s1366_s24, %s1689_s24  }
   0xc   : > { %p1667_p1 = scmp.eq.s32.totalorder %s1395_s30, 0  ;;  %p844_p2 = scmp.ge.s32.totalorder %s1312_s29, 1 }
   0xd   : > { %p227_p3 = scmp.lt.s32.totalorder %s1312_s29, 4  ;;  %s1314_s10 = smov [#allocation8]  }
   0xe   : > { %p1403_p4 = por %p1667_p1, %p59_p0  ;;  %s242_s11 = sshll.u32 %s1314_s10, 4  ;;  %s243_s11 = int_to_ptr.vmem [resolvable:$true] %s242_s11 }
   0xf   : > { %p1407_p5 = pnand %p844_p2, %p227_p3  ;;  %s1315_s13 = smov [#allocation9]  }
  0x10   : > { %s1674_s8 = scalar_select %p1403_p4, 1, 0 }
  0x11   : > { %s1675_s9 = scalar_select %p1407_p5, 1, 0 }
  0x12   : > { %p995_p6 = pneg %p1407_p5  ;;  %s258_s14 = sshll.u32 %s1315_s13, 4  ;;  %s1419_s14 = int_to_ptr.vmem [resolvable:$true] %s258_s14 }
  0x13   : > { %s1677_s3 = sld [smem:[#allocation18_spill]] }
  0x14   : > { %p1415_p7 = pnand %p995_p6, %p1667_p1 }
  0x16   : > { %p1106_p9 = pneg %p1415_p7 }
  0x19   : > { %s1104_s17 = scalar_lea.hbm %s1677_s3, 1024 }
  0x1a   : > { %p1105_p8 = scmp.ne.s32.totalorder %s1677_s3, %s1104_s17  ;;  %p1111_p12 = scmp.lt.u32.totalorder %s1104_s17, %s1677_s3 }
  0x1c   : > { %p1107_p10 = pnand %p1106_p9, %p1105_p8 }
  0x1e   : > { %p1108_p11 = pneg %p1107_p10 }
  0x20   : > { %p1113_p13 = pnand %p1111_p12, %p1108_p11 }
  0x22   : > { %1116 = shalt.err (!%p1113_p13)
}
  0x23   : > { %s1117_s22 = scalar_lea.vmem %s243_s11, 1024  ;;  %p1125_p6 = scmp.lt.s32.totalorder %s243_s11, %s243_s11 }
  0x24   : > { %p1118_p0 = scmp.ne.s32.totalorder %s243_s11, %s1117_s22  ;;  %p1126_p1 = scmp.lt.s32.totalorder %s1117_s22, %s1117_s22 }
  0x26   : > { %p1120_p2 = pnand %p1118_p0, %p1106_p9  ;;  %p1127_p4 = por %p1126_p1, %p1125_p6 }
  0x28   : > { %p1121_p3 = pneg %p1120_p2 }
  0x2a   : > { %p1128_p5 = pnand %p1127_p4, %p1121_p3 }
  0x2c   : > { %1131 = shalt.err (!%p1128_p5)
}
  0x2d   : > { %s1670_s23 = smov 64   ;;  %s1671_s24 = smov 4  }
  0x2e   : > { %998 = dma.hbm_to_vmem [thread:$0]  (!%p1415_p7), %s1677_s3, 1024, %s243_s11, [#allocation7], %s1670_s23, %s1670_s23, %s1671_s24  }
  0x2f   : > { %s1132_s17 = scalar_lea.hbm %s1664_s5, 1024 }
  0x30   : > { %p1133_p1 = scmp.ne.s32.totalorder %s1664_s5, %s1132_s17  ;;  %p1139_p8 = scmp.lt.u32.totalorder %s1132_s17, %s1664_s5 }
  0x32   : > { %p1135_p4 = pnand %p1133_p1, %p1106_p9 }
  0x34   : > { %p1136_p5 = pneg %p1135_p4 }
  0x36   : > { %p1141_p10 = pnand %p1139_p8, %p1136_p5 }
  0x38   : > { %1144 = shalt.err (!%p1141_p10)
}
  0x39   : > { %s1145_s11 = scalar_lea.vmem %s1419_s14, 1024  ;;  %p1153_p0 = scmp.lt.s32.totalorder %s1419_s14, %s1419_s14 }
  0x3a   : > { %p1146_p11 = scmp.ne.s32.totalorder %s1419_s14, %s1145_s11  ;;  %p1154_p2 = scmp.lt.s32.totalorder %s1145_s11, %s1145_s11 }
  0x3c   : > { %p1148_p12 = pnand %p1146_p11, %p1106_p9  ;;  %p1155_p3 = por %p1154_p2, %p1153_p0 }
  0x3e   : > { %p1149_p13 = pneg %p1148_p12 }
  0x40   : > { %p1156_p6 = pnand %p1155_p3, %p1149_p13 }
  0x42   : > { %1159 = shalt.err (!%p1156_p6)
}
  0x43   : > { %1001 = dma.hbm_to_vmem [thread:$0]  (!%p1415_p7), %s1664_s5, 1024, %s1419_s14, [#allocation10], %s1670_s23, %s1670_s23, %s1671_s24  }
  0x44   : > { %s34_s13 = sadd.s32 1, %s1308_s28  ;;  %s46_s12 = sadd.s32 1, %s1300_s26 }
  0x45   : > { %p35_p9 = scmp.ge.s32.totalorder %s34_s13, 3  ;;  %p53_p1 = scmp.ne.s32.totalorder %s1300_s26, %s1296_s25 }
  0x46   : > { %p54_p4 = scmp.eq.s32.totalorder %s1312_s29, 0  ;;  %p1011_p5 = scmp.lt.s32.totalorder %s1312_s29, 3 }
  0x47   : > { %s1695_s13 = smov (%p35_p9, %s34_s13), 0  ;;  %s1483_s15 = sand.u32 1, %s1300_s26  }
  0x48   : > { %p55_p8 = por %p54_p4, %p53_p1  ;;  %s42_s16 = ssub.s32 %s1308_s28, %s1695_s13 }
  0x49   : > { %p44_p10 = scmp.eq.s32.totalorder %s42_s16, 0  ;;  %s848_s14 = sshll.u32 %s1483_s15, 2 }
  0x4a   : > { %s849_s17 = sshll.u32 %s1308_s28, 6  ;;  %s1678_s0 = sld [smem:[#allocation17_spill]] }
  0x4b   : > { %s1490_s18 = scalar_select %p44_p10, %s1300_s26, %s46_s12  }
  0x4c   : > { %s279_s11 = scalar_lea.vmem [#allocation3], %s848_s14  ;;  %p1501_p7 = pnand %p1011_p5, %p55_p8 }
  0x4d   : > { %s288_s22 = sshll.u32 %s279_s11, 4  ;;  %s850_s12 = sshll.u32 %s1483_s15, 6  ;;  %s1497_s22 = int_to_ptr.vmem [resolvable:$true] %s288_s22 }
  0x4e   : > { %s276_s19 = scalar_lea.sflag [#allocation4], %s1483_s15  ;;  %p1162_p12 = pneg %p1501_p7 }
  0x50   : > { %s1495_s21 = scalar_lea.hbm %s1678_s0, %s849_s17  ;;  %s1165_s11 = scalar_lea.hbm %s1678_s0, 192 }
  0x51   : > { %s1160_s17 = scalar_lea.hbm %s1495_s21, 64  ;;  %p1166_p2 = scmp.lt.u32.totalorder %s1495_s21, %s1678_s0 }
  0x52   : > { %p1161_p11 = scmp.ne.s32.totalorder %s1495_s21, %s1160_s17  ;;  %p1167_p3 = scmp.lt.u32.totalorder %s1165_s11, %s1160_s17 }
  0x53   : > { %p1169_p9 = scmp.lt.u32.totalorder %s1160_s17, %s1495_s21 }
  0x54   : > { %p1163_p13 = pnand %p1162_p12, %p1161_p11  ;;  %p1168_p6 = por %p1167_p3, %p1166_p2 }
  0x56   : > { %p1164_p0 = pneg %p1163_p13  ;;  %p1170_p1 = por %p1169_p9, %p1168_p6 }
  0x58   : > { %p1171_p4 = pnand %p1170_p1, %p1164_p0 }
  0x5a   : > { %1174 = shalt.err (!%p1171_p4)
}
  0x5b   : > { %s1175_s16 = scalar_lea.vmem %s1497_s22, 64  ;;  %s1318_s14 = smov [#allocation3]  }
  0x5c   : > { %p1176_p5 = scmp.ne.s32.totalorder %s1497_s22, %s1175_s16  ;;  %s1180_s20 = sshll.u32 %s1318_s14, 4  ;;  %s1181_s20 = int_to_ptr.vmem [resolvable:$false] %s1180_s20 }
  0x5d   : > { %s1182_s23 = scalar_lea.vmem %s1181_s20, 128  ;;  %p1183_p11 = scmp.lt.s32.totalorder %s1497_s22, %s1181_s20 }
  0x5e   : > { %p1178_p8 = pnand %p1176_p5, %p1162_p12  ;;  %p1184_p13 = scmp.lt.s32.totalorder %s1182_s23, %s1175_s16 }
  0x60   : > { %p1179_p10 = pneg %p1178_p8  ;;  %p1185_p2 = por %p1184_p13, %p1183_p11 }
  0x62   : > { %p1186_p3 = pnand %p1185_p2, %p1179_p10 }
  0x64   : > { %1189 = shalt.err (!%p1186_p3)
}
  0x65   : > { %1005 = dma.hbm_to_vmem [thread:$0]  (!%p1501_p7), %s1495_s21, 64, %s1497_s22, %s276_s19  }
  0x66   : > { %s299_s24 = scalar_lea.vmem [#allocation6], %s850_s12  ;;  %s295_s11 = sand.u32 1, %s1312_s29  }
  0x67   : > { %s306_s17 = sshll.u32 %s299_s24, 4  ;;  %s1680_s14 = sshll.u32 %s1308_s28, 10  ;;  %s1536_s17 = int_to_ptr.vmem [resolvable:$true] %s306_s17 }
  0x68   : > { %s1543_s23 = scalar_lea.hbm %s1660_s1, %s1680_s14  ;;  %s1545_s0 = scalar_lea.sflag [#allocation7], %s295_s11 }
  0x69   : > { %s1190_s3 = scalar_lea.hbm %s1543_s23, 1024  ;;  %s1195_s22 = scalar_lea.hbm %s1660_s1, 3072 }
  0x6a   : > { %p1191_p0 = scmp.ne.s32.totalorder %s1543_s23, %s1190_s3  ;;  %p1196_p1 = scmp.lt.u32.totalorder %s1543_s23, %s1660_s1 }
  0x6b   : > { %p1197_p4 = scmp.lt.u32.totalorder %s1195_s22, %s1190_s3  ;;  %p1199_p8 = scmp.lt.u32.totalorder %s1190_s3, %s1543_s23 }
  0x6c   : > { %p1193_p6 = pnand %p1191_p0, %p1162_p12 }
  0x6d   : > { %p1198_p5 = por %p1197_p4, %p1196_p1 }
  0x6e   : > { %p1194_p9 = pneg %p1193_p6 }
  0x6f   : > { %p1200_p10 = por %p1199_p8, %p1198_p5 }
  0x71   : > { %p1201_p11 = pnand %p1200_p10, %p1194_p9 }
  0x73   : > { %1204 = shalt.err (!%p1201_p11)
}
  0x74   : > { %s1205_s24 = scalar_lea.vmem %s1536_s17, 1024  ;;  %s1319_s11 = smov [#allocation6]  }
  0x75   : > { %p1206_p13 = scmp.ne.s32.totalorder %s1536_s17, %s1205_s24  ;;  %s1210_s14 = sshll.u32 %s1319_s11, 4  ;;  %s1211_s14 = int_to_ptr.vmem [resolvable:$false] %s1210_s14 }
  0x76   : > { %s1212_s16 = scalar_lea.vmem %s1211_s14, 2048  ;;  %p1213_p0 = scmp.lt.s32.totalorder %s1536_s17, %s1211_s14 }
  0x77   : > { %p1208_p2 = pnand %p1206_p13, %p1162_p12  ;;  %p1214_p6 = scmp.lt.s32.totalorder %s1212_s16, %s1205_s24 }
  0x79   : > { %p1209_p3 = pneg %p1208_p2  ;;  %p1215_p1 = por %p1214_p6, %p1213_p0 }
  0x7b   : > { %p1216_p4 = pnand %p1215_p1, %p1209_p3 }
  0x7d   : > { %1219 = shalt.err (!%p1216_p4)
}
  0x7e   : > { %s1681_s3 = smov 4   ;;  %s1682_s20 = smov 64  }
  0x7f   : > { %1008 = dma.hbm_to_vmem [thread:$0]  (!%p1501_p7), %s1543_s23, 1024, %s1536_s17, %s1545_s0, %s1682_s20, %s1682_s20, %s1681_s3  }
  0x80   : > { %p1683_p12 = scmp.ne.s32.totalorder %s1675_s9, 0 }
  0x81   : > { %s320_s15 = sand.u32 (!%p1683_p12), 1, %s1296_s25   ;;  %p1684_p9 = scmp.ne.s32.totalorder (!%p1683_p12), %s1674_s8, 0 }
  0x82   : > { %318 = sbr.rel (%p1683_p12) target bundleno = 907 (0x38b), region = 48  ;;  %s854_s21 = sshll.u32 (!%p1683_p12), %s320_s15, 2 }
  0x83   : > { %s321_s22 = scalar_lea.sflag (!%p1683_p12), [#allocation4], %s320_s15  ;;  %s1577_s12 = scalar_lea.vmem (!%p1683_p12), [#allocation3], %s854_s21 }
  0x89   : > { %1271 = dma.done.wait (%p1684_p9), %s321_s22, 64  }
  0x8a   : > { %1273 = vsyncadd (%p1684_p9), %s321_s22, 4294967232  ;;  %s329_s10 = sand.u32 1, %s1395_s30   ;;  %s855_s19 = sshll.u32 %s320_s15, 6 }
  0x8b   : > { %s330_s0 = scalar_lea.sflag [#allocation7], %s329_s10  ;;  %s1584_s17 = scalar_lea.vmem [#allocation6], %s855_s19 }
  0x8c   : > { %1275 = dma.done.wait (%p1684_p9), %s330_s0, 1024  }
  0x8d   : > { %1277 = vsyncadd (%p1684_p9), %s330_s0, 4294966272  ;;  %p1685_p7 = scmp.eq.s32.totalorder %s1395_s30, 0 }
  0x8f   : > { %1279 = dma.done.wait (%p1685_p7), [#allocation7], 1024   ;;  %p1686_p5 = pmov %p1685_p7 }
  0x91   : > { %1281 = vsyncadd (%p1686_p5), [#allocation7], 4294966272  ;;  %p1687_p8 = pmov %p1686_p5 }
  0x92   : > { %p1688_p10 = pmov %p1686_p5 }
  0x93   : > { %1283 = dma.done.wait (%p1687_p8), [#allocation10], 1024  }
  0x94   : > { %1285 = vsyncadd (%p1688_p10), [#allocation10], 4294966272  ;;  %p858_p11 = scmp.ne.s32.totalorder %s1304_s27, 0 }
  0x95   : > { %v1320_v0 = vmov (!%p858_p11), 0.0  }
  0x96   : > { %377 = sbr.rel (%p858_p11) target bundleno = 157 (0x9d), region = 68  ;;  %378 = vst [vmem:[#allocation2] sm:$0xff] (!%p858_p11), %v1320_v0 }
  0x9d PF: > { %v1074_v1 = vld [vmem:[%s1584_s17] sm:$0xff]   ;;  %v1321_v2 = vmov 0.0   ;;  %v1075_v3 = vld [vmem:[%s1584_s17 + $0x8] sm:$0xff]   ;;  %vm1322_vm0 = vmmov 0   ;;  %v1076_v4 = vld [vmem:[%s1584_s17 + $0x10] sm:$0xff]   ;;  %p867_p13 = scmp.ne.s32.totalorder %s1304_s27, 2 }
  0x9e   : > { %919 = vmatprep.subr.bf16.mxu0 %v1321_v2  ;;  %935 = vmatprep.mubr.msk.bf16.mxu0 %vm1322_vm0, %v1321_v2  ;;  %v1077_v5 = vld [vmem:[%s1584_s17 + $0x18] sm:$0xff]   ;;  %v1078_v6 = vld [vmem:[%s1584_s17 + $0x20] sm:$0xff]   ;;  %v1079_v7 = vld [vmem:[%s1584_s17 + $0x28] sm:$0xff]   ;;  %v1323_v18 = vmov (!%p867_p13), 0.0   ;;  %vm1324_vm1 = vmmov (!%p867_p13), 0  }
  0x9f   : > { %920 = vmatpush3.bf16.msra.mxu0 %v1074_v1  ;;  %v1080_v8 = vld [vmem:[%s1584_s17 + $0x30] sm:$0xff]   ;;  %v1081_v9 = vld [vmem:[%s1584_s17 + $0x38] sm:$0xff]   ;;  %v1082_v17 = vld [vmem:[#allocation8] sm:$0xff] (!%p867_p13)   ;;  %959 = vmatprep.subr.bf16.mxu1 (!%p867_p13), %v1323_v18 }
  0xa0   : > { %921 = vmatprep.subr.bf16.mxu0 %v1321_v2  ;;  %v380_v10 = vld [vmem:[%s1577_s12] sm:$0xf]  ;;  %v379_v11 = vld [vmem:[#allocation2] sm:$0xff]  ;;  %v1083_v19 = vld [vmem:[#allocation8 + $0x8] sm:$0xff] (!%p867_p13)   ;;  %975 = vmatprep.mubr.msk.bf16.mxu1 (!%p867_p13), %vm1324_vm1, %v1323_v18 }
  0xa1   : > { %v1084_v20 = vld [vmem:[#allocation8 + $0x10] sm:$0xff] (!%p867_p13)   ;;  %v1090_v23 = vld [vmem:[#allocation9] sm:$0xff] (!%p867_p13)   ;;  %v1085_v24 = vld [vmem:[#allocation8 + $0x18] sm:$0xff] (!%p867_p13)  }
  0xa2   : > { %v868_v22 = vld [vmem:[%s1661_s2] ss:$0 sm:$0xff] (!%p867_p13)  ;;  %960 = vmatpush3.bf16.msra.mxu1 (!%p867_p13), %v1090_v23  ;;  %v1091_v25 = vld [vmem:[#allocation9 + $0x8] sm:$0xff] (!%p867_p13)   ;;  %v1086_v26 = vld [vmem:[#allocation8 + $0x20] sm:$0xff] (!%p867_p13)  }
  0xa3   : > { %922 = vmatpush3.bf16.msra.mxu0 %v1075_v3  ;;  %961 = vmatprep.subr.bf16.mxu1 (!%p867_p13), %v1323_v18  ;;  %v1092_v28 = vld [vmem:[#allocation9 + $0x10] sm:$0xff] (!%p867_p13)   ;;  %v1087_v29 = vld [vmem:[#allocation8 + $0x28] sm:$0xff] (!%p867_p13)   ;;  %v1093_v30 = vld [vmem:[#allocation9 + $0x18] sm:$0xff] (!%p867_p13)  }
  0xa4   : > { %923 = vmatprep.subr.bf16.mxu0 %v1321_v2  ;;  %v1088_v31 = vld [vmem:[#allocation8 + $0x30] sm:$0xff] (!%p867_p13)   ;;  %v1089_v33 = vld [vmem:[#allocation8 + $0x38] sm:$0xff] (!%p867_p13)   ;;  %v1094_v35 = vld [vmem:[#allocation9 + $0x20] sm:$0xff] (!%p867_p13)  }
  0xa5   : > { %v1095_v36 = vld [vmem:[#allocation9 + $0x28] sm:$0xff] (!%p867_p13)   ;;  %v1096_v37 = vld [vmem:[#allocation9 + $0x30] sm:$0xff] (!%p867_p13)   ;;  %v1097_v38 = vld [vmem:[#allocation9 + $0x38] sm:$0xff] (!%p867_p13)  }
  0xa6   : > { %962 = vmatpush3.bf16.msra.mxu1 (!%p867_p13), %v1091_v25  ;;  %v869_v39 = vld [vmem:[%s1663_s4] ss:$0 sm:$0xff] (!%p867_p13) }
  0xa7   : > { %924 = vmatpush3.bf16.msra.mxu0 %v1076_v4  ;;  %963 = vmatprep.subr.bf16.mxu1 (!%p867_p13), %v1323_v18  ;;  %v878_v47 = vld [vmem:[%s1665_s6] ss:$0 sm:$0xff] (!%p867_p13) }
  0xa8   : > { %925 = vmatprep.subr.bf16.mxu0 %v1321_v2 }
  0xaa   : > { %964 = vmatpush3.bf16.msra.mxu1 (!%p867_p13), %v1092_v28 }
  0xab   : > { %926 = vmatpush3.bf16.msra.mxu0 %v1077_v5  ;;  %965 = vmatprep.subr.bf16.mxu1 (!%p867_p13), %v1323_v18 }
  0xac   : > { %927 = vmatprep.subr.bf16.mxu0 %v1321_v2 }
  0xae   : > { %966 = vmatpush3.bf16.msra.mxu1 (!%p867_p13), %v1093_v30 }
  0xaf   : > { %928 = vmatpush3.bf16.msra.mxu0 %v1078_v6  ;;  %967 = vmatprep.subr.bf16.mxu1 (!%p867_p13), %v1323_v18 }
  0xb0   : > { %929 = vmatprep.subr.bf16.mxu0 %v1321_v2 }
  0xb2   : > { %968 = vmatpush3.bf16.msra.mxu1 (!%p867_p13), %v1094_v35 }
  0xb3   : > { %930 = vmatpush3.bf16.msra.mxu0 %v1079_v7  ;;  %969 = vmatprep.subr.bf16.mxu1 (!%p867_p13), %v1323_v18 }
  0xb4   : > { %931 = vmatprep.subr.bf16.mxu0 %v1321_v2 }
  0xb6   : > { %970 = vmatpush3.bf16.msra.mxu1 (!%p867_p13), %v1095_v36 }
  0xb7   : > { %932 = vmatpush3.bf16.msra.mxu0 %v1080_v8  ;;  %971 = vmatprep.subr.bf16.mxu1 (!%p867_p13), %v1323_v18 }
  0xb8   : > { %933 = vmatprep.subr.bf16.mxu0 %v1321_v2 }
  0xba   : > { %972 = vmatpush3.bf16.msra.mxu1 (!%p867_p13), %v1096_v37 }
  0xbb   : > { %934 = vmatpush3.bf16.msra.mxu0 %v1081_v9  ;;  %973 = vmatprep.subr.bf16.mxu1 (!%p867_p13), %v1323_v18 }
  0xbc   : > { %939 = vmatprep.subr.bf16.mxu0 (!%p867_p13), %v1323_v18 }
  0xbe   : > { %936 = vmatmul.mubr.bf16.vlgmr.msra.gmra.mrb[0].mxu0 %v380_v10  ;;  %974 = vmatpush3.bf16.msra.mxu1 (!%p867_p13), %v1097_v38 }
  0xbf   : > { %940 = vmatpush3.bf16.msra.mxu0 (!%p867_p13), %v1082_v17  ;;  %955 = vmatprep.mubr.msk.bf16.mxu0 (!%p867_p13), %vm1324_vm1, %v1323_v18 }
  0xc0   : > { %941 = vmatprep.subr.bf16.mxu0 (!%p867_p13), %v1323_v18 }
  0xc3   : > { %942 = vmatpush3.bf16.msra.mxu0 (!%p867_p13), %v1083_v19 }
  0xc4   : > { %943 = vmatprep.subr.bf16.mxu0 (!%p867_p13), %v1323_v18 }
  0xc7   : > { %944 = vmatpush3.bf16.msra.mxu0 (!%p867_p13), %v1084_v20 }
  0xc8   : > { %945 = vmatprep.subr.bf16.mxu0 (!%p867_p13), %v1323_v18 }
  0xcb   : > { %946 = vmatpush3.bf16.msra.mxu0 (!%p867_p13), %v1085_v24 }
  0xcc   : > { %947 = vmatprep.subr.bf16.mxu0 (!%p867_p13), %v1323_v18 }
  0xcf   : > { %948 = vmatpush3.bf16.msra.mxu0 (!%p867_p13), %v1086_v26 }
  0xd0   : > { %949 = vmatprep.subr.bf16.mxu0 (!%p867_p13), %v1323_v18 }
  0xd3   : > { %950 = vmatpush3.bf16.msra.mxu0 (!%p867_p13), %v1087_v29 }
  0xd4   : > { %951 = vmatprep.subr.bf16.mxu0 (!%p867_p13), %v1323_v18 }
  0xd7   : > { %952 = vmatpush3.bf16.msra.mxu0 (!%p867_p13), %v1088_v31 }
  0xd8   : > { %953 = vmatprep.subr.bf16.mxu0 (!%p867_p13), %v1323_v18 }
  0xdb   : > { %954 = vmatpush3.bf16.msra.mxu0 (!%p867_p13), %v1089_v33 }
 0x18e   : > { %490 = sbr.rel (%p867_p13) target bundleno = 882 (0x372), region = 72 }
 0x191   : > { %v479_v12 = vpop.f32.mrb[0].mxu0 }
 0x192   : > { %v485_v13 = vadd.f32 %v479_v12, %v379_v11  ;;  %v937_v14 = vpop.f32.mrb[1].mxu0 }
 0x193   : > { %v482_v15 = vpop.f32.mrb[2].mxu0 }
 0x194   : > { %486 = vst [vmem:[#allocation2] sm:$0xff] %v485_v13  ;;  %v938_v16 = vpop.f32.mrb[3].mxu0 }
 0x19b   : > { %v491_v21 = vld [vmem:[#allocation2] sm:$0xff] }
 0x19c   : > { %v499_v27 = vadd.f32 %v868_v22, %v491_v21 }
 0x19e   : > { %1098 = vtanh.f32 %v499_v27 }
 0x1a8   : > { %v1099_v32 = vpop.eup %1098 }
 0x1a9   : > { %v501_v34 = vpack.c.bf16 %v1099_v32, %v1099_v32 }
 0x1ab   : > { %956 = vmatmul.mubr.bf16.vlgmr.msra.gmra.mrb[0].mxu0 %v501_v34 }
 0x27e   : > { %v607_v40 = vpop.f32.mrb[0].mxu0 }
 0x27f   : > { %v608_v41 = vadd.f32 %v869_v39, %v607_v40  ;;  %v957_v42 = vpop.f32.mrb[1].mxu0 }
 0x280   : > { %v610_v43 = vpop.f32.mrb[2].mxu0 }
 0x281   : > { %1100 = vtanh.f32 %v608_v41  ;;  %v958_v44 = vpop.f32.mrb[3].mxu0 }
 0x28b   : > { %v1101_v45 = vpop.eup %1100 }
 0x28c   : > { %v614_v46 = vpack.c.bf16 %v1101_v45, %v1101_v45 }
 0x28e   : > { %976 = vmatmul.mubr.bf16.vlgmr.msra.gmra.mrb[0].mxu1 %v614_v46 }
 0x361   : > { %v720_v48 = vpop.f32.mrb[0].mxu1 }
 0x362   : > { %v721_v49 = vadd.f32 %v878_v47, %v720_v48  ;;  %v977_v50 = vpop.f32.mrb[1].mxu1 }
 0x363   : > { %v723_v51 = vpop.f32.mrb[2].mxu1 }
 0x364   : > { %1102 = vtanh.f32 %v721_v49  ;;  %v978_v52 = vpop.f32.mrb[3].mxu1 }
 0x36e   : > { %v1103_v53 = vpop.eup %1102 }
 0x36f   : > { %v727_v54 = vpack.c.bf16 %v1103_v53, %v1103_v53 }
 0x371   : > { %728 = vst [vmem:[#allocation11] sm:$0xf] %v727_v54 }
 0x372 PF: > { %p1014_p2 = scmp.eq.s32.totalorder %s1395_s30, 2  ;;  %s1325_s14 = smov [#allocation11]  }
 0x373   : > { %s738_s16 = sshll.u32 %s1325_s14, 4  ;;  %s739_s16 = int_to_ptr.vmem [resolvable:$true] %s738_s16 }
 0x374   : > { %s1220_s3 = scalar_lea.vmem %s739_s16, 64  ;;  %p1227_p1 = scmp.lt.s32.totalorder %s739_s16, %s739_s16 }
 0x375   : > { %p1221_p3 = scmp.ne.s32.totalorder %s739_s16, %s1220_s3  ;;  %p1228_p4 = scmp.lt.s32.totalorder %s1220_s3, %s1220_s3 }
 0x377   : > { %p1222_p0 = pnand %p1221_p3, %p1014_p2  ;;  %p1229_p12 = por %p1228_p4, %p1227_p1 }
 0x379   : > { %p1223_p6 = pneg %p1222_p0 }
 0x37b   : > { %p1230_p9 = pnand %p1229_p12, %p1223_p6 }
 0x37d   : > { %1233 = shalt.err (!%p1230_p9)
}
 0x37e   : > { %s1234_s21 = scalar_lea.hbm %s1666_s7, 64 }
 0x37f   : > { %p1235_p7 = scmp.ne.s32.totalorder %s1666_s7, %s1234_s21  ;;  %p1240_p10 = scmp.lt.u32.totalorder %s1234_s21, %s1666_s7 }
 0x381   : > { %p1236_p5 = pnand %p1235_p7, %p1014_p2 }
 0x383   : > { %p1237_p8 = pneg %p1236_p5 }
 0x385   : > { %p1242_p11 = pnand %p1240_p10, %p1237_p8 }
 0x387   : > { %1245 = shalt.err (!%p1242_p11)
}
 0x388   : > { %992 = dma.vmem_to_hbm [thread:$0]  (%p1014_p2), %s739_s16, 64, %s1666_s7, [#allocation5]  }
 0x389   : > { %1287 = dma.done.wait (%p1014_p2), [#allocation5], 64  }
 0x38a   : > { %1289 = vsyncadd (%p1014_p2), [#allocation5], 4294967232 }
 0x38b PF: > { %s25_s29 = sadd.s32 1, %s1312_s29   ;;  %s1689_s24 = smov %s1296_s25 }
 0x38c   : > { %p22_p13 = scmp.ge.s32.totalorder %s25_s29, 5   ;;  %s1690_s25 = smov %s1300_s26 }
 0x38d   : > { %s1691_s26 = smov %s1490_s18  ;;  %s1692_s27 = smov %s1308_s28 }
 0x38e   : > { %s1693_s28 = smov %s1695_s13  ;;  %24 = sbr.rel (!%p22_p13) target bundleno = 11 (0xb), region = 115 }
 0x395   :  { %751 = vsyncpa [#allocation4], 1 }
 0x396   :  { %753 = vsyncpa [#allocation4 + $0x1], 1 }
 0x397   :  { %754 = vsyncpa [#allocation7], 1 }
 0x398   :  { %756 = vsyncpa [#allocation7 + $0x1], 1 }
 0x399   :  { %757 = vsyncpa [#allocation10], 1 }
 0x39a   :  { %758 = vsyncpa [#allocation5], 1 }
 0x39b   :  { %760 = vsyncpa [#allocation5 + $0x1], 1 }

</bundles_post_ra>
